<compile_context>
chip_gen: v6e
topology: v6e:2x2x1
jax: 0.10.0
libtpu: 0.0.40
codegen_flags: <defaults>
</compile_context>

<pallas_src>
import jax
import jax.numpy as jnp
from jax.experimental import pallas as pl
from jax.experimental.pallas import tpu as pltpu


def mlp_kernel(x_ref, w1_ref, b1_ref, w2_ref, b2_ref, w3_ref, b3_ref, o_ref):
    # All-f32: MXU matmuls with f32 accumulation; bias add + ReLU on the VPU.
    h1 = jnp.dot(x_ref[...], w1_ref[...], preferred_element_type=jnp.float32)
    h1 = jnp.maximum(h1 + b1_ref[...], 0.0)
    h2 = jnp.dot(h1, w2_ref[...], preferred_element_type=jnp.float32)
    h2 = jnp.maximum(h2 + b2_ref[...], 0.0)
    y = jnp.dot(h2, w3_ref[...], preferred_element_type=jnp.float32)
    o_ref[...] = (y + b3_ref[...]).astype(o_ref.dtype)


def _round_up(x, m):
    return (x + m - 1) // m * m


def neuralnet_forward(x, w1, b1, w2, b2, w3, b3, *, block_n=2048, min_tiles=4):
    """Forward pass of NeuralNet: relu(relu(x@W1+b1)@W2+b2)@W3+b3 (all f32)."""
    N, in_size = x.shape
    h1_size, h2_size = w1.shape[1], w2.shape[1]
    out_size = w3.shape[1]

    # Row tile: as large as possible (amortizes per-grid-step overhead) while
    # keeping >= min_tiles steps when N allows it (feeds both v7x TensorCores
    # via the "parallel" grid axis). bn is always a multiple of 8 (sublanes).
    n_rows = _round_up(N, 8)
    bn = max(8, min(block_n, _round_up(pl.cdiv(n_rows, min_tiles), 8)))
    n_p = _round_up(N, bn)
    if n_p != N:
        # Zero-padded rows: they produce rows we slice off; features untouched.
        x = jnp.pad(x, ((0, n_p - N), (0, 0)))
    grid = (n_p // bn,)

    resident = lambda a: pl.BlockSpec(a.shape, lambda i: (0, 0))

    # Accurate (unpadded) cost hint for XLA's scheduler.
    flops = 2 * n_p * (in_size * h1_size + h1_size * h2_size + h2_size * out_size)
    bytes_accessed = 4 * (
        n_p * in_size                      # x read
        + in_size * h1_size + h1_size      # w1, b1
        + h1_size * h2_size + h2_size      # w2, b2
        + h2_size * out_size + out_size    # w3, b3
        + n_p * out_size                   # output write
    )

    out = pl.pallas_call(
        mlp_kernel,
        out_shape=jax.ShapeDtypeStruct((n_p, out_size), jnp.float32),
        grid=grid,
        in_specs=[
            # x: row-tiled; last dim equals the full array dim (no lane padding).
            pl.BlockSpec((bn, in_size), lambda i: (i, 0)),
            resident(w1), resident(b1),    # params stay VMEM-resident
            resident(w2), resident(b2),
            resident(w3), resident(b3),
        ],
        # Output emitted at its true width; only padded rows are sliced off.
        out_specs=pl.BlockSpec((bn, out_size), lambda i: (i, 0)),
        compiler_params=pltpu.CompilerParams(
            dimension_semantics=("parallel",)),
        cost_estimate=pl.CostEstimate(
            flops=flops, transcendentals=0, bytes_accessed=bytes_accessed),
    )(x, w1, b1, w2, b2, w3, b3)

    return out[:N]


def init_params(key, in_size, out_size, hidden1=64, hidden2=32):
    """Deterministic init mimicking torch.nn.Linear's U(-1/sqrt(fan_in), +)."""
    ks = jax.random.split(key, 6)

    def linear(kw, kb, fan_in, fan_out):
        bound = 1.0 / jnp.sqrt(fan_in)
        w = jax.random.uniform(kw, (fan_in, fan_out), jnp.float32, -bound, bound)
        b = jax.random.uniform(kb, (1, fan_out), jnp.float32, -bound, bound)
        return w, b

    w1, b1 = linear(ks[0], ks[1], in_size, hidden1)
    w2, b2 = linear(ks[2], ks[3], hidden1, hidden2)
    w3, b3 = linear(ks[4], ks[5], hidden2, out_size)
    return w1, b1, w2, b2, w3, b3


def _ref(x, w1, b1, w2, b2, w3, b3):
    h = jnp.maximum(x @ w1 + b1, 0.0)
    h = jnp.maximum(h @ w2 + b2, 0.0)
    return h @ w3 + b3


if __name__ == "__main__":
    # TODO(synk): NeuralNet.step/loss_fn/Adam (training) are out of scope for a
    # forward-pass kernel and are not implemented here.
    key = jax.random.PRNGKey(0)
    k_x, k_x2, k_p = jax.random.split(key, 3)

    in_size, out_size = 16, 4
    params = init_params(k_p, in_size, out_size)

    # Small case (single grid step, bn = 8 rows).
    N = 8
    x = jax.random.normal(k_x, (N, in_size), jnp.float32)
    y = jax.block_until_ready(neuralnet_forward(x, *params))
    y_ref = _ref(x, *params)
    assert y.shape == (N, out_size)
    # Tolerance covers possible multi-pass MXU f32 handling on either side.
    assert jnp.allclose(y, y_ref, atol=5e-3, rtol=5e-3), float(jnp.max(jnp.abs(y - y_ref)))

    # Larger batch: exercises the multi-step parallel row grid with resident weights.
    N2 = 1024
    x2 = jax.random.normal(k_x2, (N2, in_size), jnp.float32)
    y2 = jax.block_until_ready(neuralnet_forward(x2, *params))
    y2_ref = _ref(x2, *params)
    assert y2.shape == (N2, out_size)
    assert jnp.allclose(y2, y2_ref, atol=5e-3, rtol=5e-3), float(jnp.max(jnp.abs(y2 - y2_ref)))

    print("KERNEL_OK")
</pallas_src>

<mosaic_0001>
module attributes {stable_mosaic.version = 11 : i64} {
  func.func @mlp_kernel(%arg0: i32, %arg1: memref<8x16xf32, #tpu.memory_space<vmem>>, %arg2: memref<16x64xf32, #tpu.memory_space<vmem>>, %arg3: memref<1x64xf32, #tpu.memory_space<vmem>>, %arg4: memref<64x32xf32, #tpu.memory_space<vmem>>, %arg5: memref<1x32xf32, #tpu.memory_space<vmem>>, %arg6: memref<32x4xf32, #tpu.memory_space<vmem>>, %arg7: memref<1x4xf32, #tpu.memory_space<vmem>>, %arg8: memref<8x4xf32, #tpu.memory_space<vmem>>) attributes {dimension_semantics = [#tpu.dimension_semantics<parallel>], iteration_bounds = array<i64: 1>, scalar_prefetch = 0 : i64, scratch_operands = 0 : i64, tpu.core_type = #tpu.core_type<tc>, window_params = [{transform_indices = @transform_0, window_bounds = array<i64: 8, 16>}, {pipeline_mode = #tpu.pipeline_mode<synchronous>, transform_indices = @transform_1, window_bounds = array<i64: 16, 64>}, {pipeline_mode = #tpu.pipeline_mode<synchronous>, transform_indices = @transform_2, window_bounds = array<i64: 1, 64>}, {pipeline_mode = #tpu.pipeline_mode<synchronous>, transform_indices = @transform_3, window_bounds = array<i64: 64, 32>}, {pipeline_mode = #tpu.pipeline_mode<synchronous>, transform_indices = @transform_4, window_bounds = array<i64: 1, 32>}, {pipeline_mode = #tpu.pipeline_mode<synchronous>, transform_indices = @transform_5, window_bounds = array<i64: 32, 4>}, {pipeline_mode = #tpu.pipeline_mode<synchronous>, transform_indices = @transform_6, window_bounds = array<i64: 1, 4>}, {transform_indices = @transform_7, window_bounds = array<i64: 8, 4>}]} {
    %c0 = arith.constant 0 : index
    %c0_0 = arith.constant 0 : index
    %0 = vector.load %arg1[%c0, %c0_0] : memref<8x16xf32, #tpu.memory_space<vmem>>, vector<8x16xf32>
    %c0_1 = arith.constant 0 : index
    %c0_2 = arith.constant 0 : index
    %1 = vector.load %arg2[%c0_1, %c0_2] : memref<16x64xf32, #tpu.memory_space<vmem>>, vector<16x64xf32>
    %cst = arith.constant dense<0.000000e+00> : vector<8x64xf32>
    %2 = tpu.matmul %0, %1, %cst {dimension_numbers = #tpu.dot_dimension_numbers<[1], [0], [0], [1], [0, 0, 1, 1], [], []>} : vector<8x16xf32>, vector<16x64xf32>, vector<8x64xf32> -> vector<8x64xf32>
    %c0_3 = arith.constant 0 : index
    %c0_4 = arith.constant 0 : index
    %3 = vector.load %arg3[%c0_3, %c0_4] : memref<1x64xf32, #tpu.memory_space<vmem>>, vector<1x64xf32>
    %4 = vector.broadcast %3 : vector<1x64xf32> to vector<8x64xf32>
    %5 = arith.addf %2, %4 : vector<8x64xf32>
    %cst_5 = arith.constant 0.000000e+00 : f32
    %6 = vector.broadcast %cst_5 : f32 to vector<8x64xf32>
    %7 = arith.maximumf %5, %6 : vector<8x64xf32>
    %c0_6 = arith.constant 0 : index
    %c0_7 = arith.constant 0 : index
    %8 = vector.load %arg4[%c0_6, %c0_7] : memref<64x32xf32, #tpu.memory_space<vmem>>, vector<64x32xf32>
    %cst_8 = arith.constant dense<0.000000e+00> : vector<8x32xf32>
    %9 = tpu.matmul %7, %8, %cst_8 {dimension_numbers = #tpu.dot_dimension_numbers<[1], [0], [0], [1], [0, 0, 1, 1], [], []>} : vector<8x64xf32>, vector<64x32xf32>, vector<8x32xf32> -> vector<8x32xf32>
    %c0_9 = arith.constant 0 : index
    %c0_10 = arith.constant 0 : index
    %10 = vector.load %arg5[%c0_9, %c0_10] : memref<1x32xf32, #tpu.memory_space<vmem>>, vector<1x32xf32>
    %11 = vector.broadcast %10 : vector<1x32xf32> to vector<8x32xf32>
    %12 = arith.addf %9, %11 : vector<8x32xf32>
    %cst_11 = arith.constant 0.000000e+00 : f32
    %13 = vector.broadcast %cst_11 : f32 to vector<8x32xf32>
    %14 = arith.maximumf %12, %13 : vector<8x32xf32>
    %c0_12 = arith.constant 0 : index
    %c0_13 = arith.constant 0 : index
    %15 = vector.load %arg6[%c0_12, %c0_13] : memref<32x4xf32, #tpu.memory_space<vmem>>, vector<32x4xf32>
    %cst_14 = arith.constant dense<0.000000e+00> : vector<8x4xf32>
    %16 = tpu.matmul %14, %15, %cst_14 {dimension_numbers = #tpu.dot_dimension_numbers<[1], [0], [0], [1], [0, 0, 1, 1], [], []>} : vector<8x32xf32>, vector<32x4xf32>, vector<8x4xf32> -> vector<8x4xf32>
    %c0_15 = arith.constant 0 : index
    %c0_16 = arith.constant 0 : index
    %17 = vector.load %arg7[%c0_15, %c0_16] : memref<1x4xf32, #tpu.memory_space<vmem>>, vector<1x4xf32>
    %18 = vector.broadcast %17 : vector<1x4xf32> to vector<8x4xf32>
    %19 = arith.addf %16, %18 : vector<8x4xf32>
    %c0_17 = arith.constant 0 : index
    %c0_18 = arith.constant 0 : index
    %20 = vector.load %arg8[%c0_17, %c0_18] : memref<8x4xf32, #tpu.memory_space<vmem>>, vector<8x4xf32>
    tpu.vector_store %arg8[%c0_17, %c0_18], %19 {strides = array<i32>} : memref<8x4xf32, #tpu.memory_space<vmem>>, vector<8x4xf32>,
    return
  }
  func.func @transform_0(%arg0: i32) -> (i32, i32) {
    %c0_i32 = arith.constant 0 : i32
    %c0_i32_0 = arith.constant 0 : i32
    return %arg0, %c0_i32 : i32, i32
  }
  func.func @transform_1(%arg0: i32) -> (i32, i32) {
    %c0_i32 = arith.constant 0 : i32
    %c0_i32_0 = arith.constant 0 : i32
    %c0_i32_1 = arith.constant 0 : i32
    return %c0_i32, %c0_i32_0 : i32, i32
  }
  func.func @transform_2(%arg0: i32) -> (i32, i32) {
    %c0_i32 = arith.constant 0 : i32
    %c0_i32_0 = arith.constant 0 : i32
    %c0_i32_1 = arith.constant 0 : i32
    return %c0_i32, %c0_i32_0 : i32, i32
  }
  func.func @transform_3(%arg0: i32) -> (i32, i32) {
    %c0_i32 = arith.constant 0 : i32
    %c0_i32_0 = arith.constant 0 : i32
    %c0_i32_1 = arith.constant 0 : i32
    return %c0_i32, %c0_i32_0 : i32, i32
  }
  func.func @transform_4(%arg0: i32) -> (i32, i32) {
    %c0_i32 = arith.constant 0 : i32
    %c0_i32_0 = arith.constant 0 : i32
    %c0_i32_1 = arith.constant 0 : i32
    return %c0_i32, %c0_i32_0 : i32, i32
  }
  func.func @transform_5(%arg0: i32) -> (i32, i32) {
    %c0_i32 = arith.constant 0 : i32
    %c0_i32_0 = arith.constant 0 : i32
    %c0_i32_1 = arith.constant 0 : i32
    return %c0_i32, %c0_i32_0 : i32, i32
  }
  func.func @transform_6(%arg0: i32) -> (i32, i32) {
    %c0_i32 = arith.constant 0 : i32
    %c0_i32_0 = arith.constant 0 : i32
    %c0_i32_1 = arith.constant 0 : i32
    return %c0_i32, %c0_i32_0 : i32, i32
  }
  func.func @transform_7(%arg0: i32) -> (i32, i32) {
    %c0_i32 = arith.constant 0 : i32
    %c0_i32_0 = arith.constant 0 : i32
    return %arg0, %c0_i32 : i32, i32
  }
}

</mosaic_0001>

<bundles_post_ra>
// kernel: tpu_custom_call.1
= control target key start
LH: loop header
LB: loop body
LE: loop exit
PB: predicated region body
PF: predicated region fallthrough
CT: control target
= control target key end

     0   :  { %v354_v0 = vmov 0.0   ;;  %vm355_vm0 = vmmov 0   ;;  %vm36_vm1 = vcmask 130048   ;;  %vm126_vm2 = vcmask 523264   ;;  %s456_s1 = inlined_call_operand.vmem [shape: f32[16,64], index: 1, kind: input, shape index: {}]   ;;  %s457_s0 = inlined_call_operand.vmem [shape: f32[8,16], index: 0, kind: input, shape index: {}]   ;;  %s458_s3 = inlined_call_operand.vmem [shape: f32[64,32], index: 3, kind: input, shape index: {}]   ;;  %s459_s5 = inlined_call_operand.vmem [shape: f32[32,4], index: 5, kind: input, shape index: {}]   ;;  %s460_s2 = inlined_call_operand.vmem [shape: f32[1,64], index: 2, kind: input, shape index: {}]   ;;  %s461_s4 = inlined_call_operand.vmem [shape: f32[1,32], index: 4, kind: input, shape index: {}]   ;;  %s462_s6 = inlined_call_operand.vmem [shape: f32[1,4], index: 6, kind: input, shape index: {}]   ;;  %s463_s7 = inlined_call_operand.vmem [shape: f32[8,4], index: 7, kind: output, shape index: {}]  }
   0x1   :  { %315 = vmatprep.subr.mxu0 %v354_v0  ;;  %v28_v1 = vld [vmem:[%s456_s1 + $0x8] sm:$0xff]  ;;  %v27_v2 = vld [vmem:[%s456_s1] sm:$0xff]  ;;  %319 = vmatprep.mubr.msk.f32.mxu0 %vm355_vm0, %v354_v0  ;;  %v118_v4 = vld [vmem:[%s458_s3 + $0x38] sm:$0xff]  ;;  %vm212_vm3 = vcmask 261120   ;;  %vm286_vm4 = vcmask 31744  }
   0x2   :  { %316 = vmatpush3.msra.mxu0 %v28_v1  ;;  %v26_v3 = vld [vmem:[%s457_s0] sm:$0xff]  ;;  %322 = vmatprep.subr.mxu1 %v354_v0  ;;  %v117_v5 = vld [vmem:[%s458_s3 + $0x30] sm:$0xff]  ;;  %v116_v6 = vld [vmem:[%s458_s3 + $0x28] sm:$0xff] }
   0x3   :  { %317 = vmatprep.subr.mxu0 %v354_v0  ;;  %323 = vmatpush3.msra.mxu1 %v118_v4  ;;  %v115_v7 = vld [vmem:[%s458_s3 + $0x20] sm:$0xff]  ;;  %v114_v8 = vld [vmem:[%s458_s3 + $0x18] sm:$0xff]  ;;  %v113_v9 = vld [vmem:[%s458_s3 + $0x10] sm:$0xff] }
   0x4   :  { %318 = vmatpush3.msra.mxu0 %v27_v2  ;;  %324 = vmatprep.subr.mxu1 %v354_v0  ;;  %v112_v10 = vld [vmem:[%s458_s3 + $0x8] sm:$0xff]  ;;  %v111_v11 = vld [vmem:[%s458_s3] sm:$0xff]  ;;  %v204_v12 = vld [vmem:[%s459_s5 + $0x18] sm:$0xff] }
   0x5   :  { %320 = vmatmul.mubr.msk.f32.vlgmr.msra.gmra.mxu0 %vm36_vm1, %v26_v3  ;;  %325 = vmatpush3.msra.mxu1 %v117_v5  ;;  %v292_v13 = vld [vmem:[%s460_s2] ss:$0 sm:$0xff]  ;;  %v203_v18 = vld [vmem:[%s459_s5 + $0x10] sm:$0xff]  ;;  %v202_v19 = vld [vmem:[%s459_s5 + $0x8] sm:$0xff] }
   0x6   :  { %326 = vmatprep.subr.mxu1 %v354_v0  ;;  %338 = vmatprep.mubr.msk.f32.mxu1 %vm355_vm0, %v354_v0  ;;  %v201_v20 = vld [vmem:[%s459_s5] sm:$0xff] }
   0x7   :  { %327 = vmatpush3.msra.mxu1 %v116_v6  ;;  %341 = vmatprep.subr.mxu0 %v354_v0  ;;  %v294_v21 = vld [vmem:[%s461_s4] ss:$0 sm:$0xff] }
   0x8   :  { %328 = vmatprep.subr.mxu1 %v354_v0  ;;  %349 = vmatprep.mubr.msk.f32.mxu0 %vm355_vm0, %v354_v0  ;;  %v296_v26 = vld [vmem:[%s462_s6] ss:$0 sm:$0xff] }
   0x9   :  { %329 = vmatpush3.msra.mxu1 %v115_v7  ;;  %342 = vmatpush3.msra.mxu0 %v204_v12 }
   0xa   :  { %330 = vmatprep.subr.mxu1 %v354_v0  ;;  %343 = vmatprep.subr.mxu0 %v354_v0 }
   0xb   :  { %331 = vmatpush3.msra.mxu1 %v114_v8  ;;  %344 = vmatpush3.msra.mxu0 %v203_v18 }
   0xc   :  { %332 = vmatprep.subr.mxu1 %v354_v0  ;;  %345 = vmatprep.subr.mxu0 %v354_v0 }
   0xd   :  { %333 = vmatpush3.msra.mxu1 %v113_v9  ;;  %346 = vmatpush3.msra.mxu0 %v202_v19 }
   0xe   :  { %334 = vmatprep.subr.mxu1 %v354_v0  ;;  %347 = vmatprep.subr.mxu0 %v354_v0 }
   0xf   :  { %335 = vmatpush3.msra.mxu1 %v112_v10  ;;  %348 = vmatpush3.msra.mxu0 %v201_v20 }
  0x10   :  { %336 = vmatprep.subr.mxu1 %v354_v0 }
  0x11   :  { %337 = vmatpush3.msra.mxu1 %v111_v11 }
  0xc5   :  { %v106_v14 = vpop.f32.mrf.mxu0 }
  0xc6   :  { %v107_v15 = vadd.f32 %v292_v13, %v106_v14 }
  0xc7   :  { %v321_v16 = vpop.f32.mrf.mxu0 }
  0xc8   :  { %v110_v17 = vmax.f32 %v107_v15, 0.0 }
  0xca   :  { %339 = vmatmul.mubr.msk.f32.vlgmr.msra.gmra.mxu1 %vm126_vm2, %v110_v17 }
 0x18a   :  { %v196_v22 = vpop.f32.mrf.mxu1 }
 0x18b   :  { %v197_v23 = vadd.f32 %v294_v21, %v196_v22 }
 0x18c   :  { %v340_v24 = vpop.f32.mrf.mxu1 }
 0x18d   :  { %v200_v25 = vmax.f32 %v197_v23, 0.0 }
 0x18f   :  { %350 = vmatmul.mubr.msk.f32.vlgmr.msra.gmra.mxu0 %vm212_vm3, %v200_v25 }
 0x24f   :  { %v282_v27 = vpop.f32.mrf.mxu0 }
 0x250   :  { %v283_v28 = vadd.f32 %v296_v26, %v282_v27 }
 0x251   :  { %v351_v29 = vpop.f32.mrf.mxu0 }
 0x252   :  { %287 = vst.msk [vmem:[%s463_s7] sm:$0xff] %vm286_vm4, %v283_v28 }

</bundles_post_ra>
